<compile_context>
chip_gen: v6e
topology: v6e:2x2x1
jax: 0.10.0
libtpu: 0.0.40
codegen_flags: <defaults>
</compile_context>

<pallas_src>
import functools

import jax
import jax.numpy as jnp
from jax.experimental import pallas as pl
from jax.experimental.pallas import tpu as pltpu

LANES = 128


def _round_up(x, m):
    return (x + m - 1) // m * m


def _make_sq_diff_kernel(block_rows, acc_rows, steps_per_part, n_blocks,
                         rows_valid, need_mask, has_overhang):
    """Build the per-tile kernel. All args are static Python ints/bools."""

    def accumulate(k_ref, y_ref, o_ref, blk, masked):
        d = k_ref[...].astype(jnp.float32) - y_ref[...].astype(jnp.float32)
        sq = d * d
        if masked:
            # Rows past the real extent of the slab read unspecified VMEM in
            # the (globally) last, partial block; zero them before the fold.
            row0 = blk * block_rows
            local_row = jax.lax.broadcasted_iota(jnp.int32, (sq.shape[0], 1), 0)
            sq = jnp.where(row0 + local_row < rows_valid, sq, 0.0)
        # Fold (block_rows, 128) -> (acc_rows, 128): pure VPU adds over many
        # independent vreg chains (no XLU, no scalar chain).  The final
        # cross-lane reduce + /N * 1e5 happens in the wrapper.
        folded = jnp.sum(sq.reshape(-1, acc_rows, LANES), axis=0)
        o_ref[...] += folded.reshape(1, acc_rows, LANES)

    def kernel(k_ref, y_ref, o_ref):
        p = pl.program_id(0)   # TensorCore partition (parallel)
        i = pl.program_id(1)   # reduction step within partition (arbitrary)

        @pl.when(i == 0)
        def _():
            o_ref[...] = jnp.zeros_like(o_ref)

        blk = p * steps_per_part + i

        if need_mask or has_overhang:
            last_blk = n_blocks - 1

            # Fast, unmasked path for all full blocks.
            @pl.when(blk < last_blk)
            def _():
                accumulate(k_ref, y_ref, o_ref, blk, False)

            # Last real block: masked only if it is partial.  Overhang steps
            # of the 2-way split (blk > last_blk) contribute nothing.
            @pl.when(blk == last_blk)
            def _():
                accumulate(k_ref, y_ref, o_ref, blk, need_mask)
        else:
            accumulate(k_ref, y_ref, o_ref, blk, False)

    return kernel


def kernel_loss(k, y, *, block_rows=None, target_block_bytes=4 << 20):
    """Reproduces: nn.MSELoss()(k, y) * 100000  (mean reduction)."""
    assert k.shape == y.shape, "k and y must have the same shape"
    n_elems = k.size

    # Flatten (free for contiguous arrays).  Keep the original dtype: the cast
    # to f32 happens inside the kernel, so bf16/fp8 inputs move half/quarter
    # the HBM bytes.
    k_flat = jnp.ravel(k)
    y_flat = jnp.ravel(y)

    rows_body = n_elems // LANES
    n_tail = n_elems - rows_body * LANES

    # <128-element tail handled as a tiny plain-XLA op (no jnp.pad, which would
    # materialize a full extra HBM copy of both inputs).
    if n_tail:
        kt = k_flat[rows_body * LANES:].astype(jnp.float32)
        yt = y_flat[rows_body * LANES:].astype(jnp.float32)
        tail_sum = jnp.sum((kt - yt) * (kt - yt))
    else:
        tail_sum = jnp.float32(0.0)

    if rows_body == 0:
        return (tail_sum / jnp.float32(n_elems)) * jnp.float32(100000.0)

    k2d = k_flat[: rows_body * LANES].reshape(rows_body, LANES)
    y2d = y_flat[: rows_body * LANES].reshape(rows_body, LANES)

    # Sublane multiple per dtype: f32 -> 8, bf16/f16 -> 16, int8/fp8 -> 32.
    itemsize = jnp.dtype(k.dtype).itemsize
    mult = max(8, 32 // max(itemsize, 1))

    # Block size: big enough to amortize the ~0.35 us fixed per-step overhead;
    # dtype-aware so narrow dtypes keep the same per-step HBM traffic.
    if block_rows is None:
        block_rows_target = max(
            mult, (target_block_bytes // (LANES * itemsize)) // mult * mult)
    else:
        block_rows_target = max(mult, _round_up(block_rows, mult))

    if rows_body <= block_rows_target:
        # Single block covering the whole slab (a full-extent block shape is
        # always legal, even when not a multiple of 8).
        block_rows_eff = rows_body
    else:
        block_rows_eff = block_rows_target

    n_blocks = pl.cdiv(rows_body, block_rows_eff)
    need_mask = (rows_body % block_rows_eff) != 0

    # Unconditional 2-way split across TensorCores whenever there is more than
    # one block (v7x megacore); neutral on single-TC v5e/v6e.
    num_parts = 2 if n_blocks >= 2 else 1
    steps_per_part = pl.cdiv(n_blocks, num_parts)
    has_overhang = num_parts * steps_per_part > n_blocks

    # Wider resident accumulator (up to 256 rows): many independent VALU chains
    # instead of one deep serial fold into a single (8,128) vreg.
    acc_rows = block_rows_eff
    for cand in (256, 128, 64, 32, 16, 8):
        if cand <= block_rows_eff and block_rows_eff % cand == 0:
            acc_rows = cand
            break

    if has_overhang:
        def in_idx(p, i):
            # Clamp the overhang step of the last partition to a valid block;
            # its contribution is skipped inside the kernel.
            return (jnp.minimum(p * steps_per_part + i, n_blocks - 1), 0)
    else:
        def in_idx(p, i):
            return (p * steps_per_part + i, 0)

    kernel = _make_sq_diff_kernel(
        block_rows_eff, acc_rows, steps_per_part, n_blocks, rows_body,
        need_mask, has_overhang)

    # Explicit VMEM budget: 2 inputs x 2 pipeline buffers x block bytes, plus
    # room for f32 intermediates and the resident accumulator/output, plus
    # slack.  Capped well under v7x's 64 MiB physical per-TC VMEM.
    block_bytes = block_rows_eff * LANES * itemsize
    f32_block_bytes = block_rows_eff * LANES * 4
    out_bytes = acc_rows * LANES * 4
    vmem_limit = int(2 * 2 * block_bytes + 4 * f32_block_bytes
                     + 4 * out_bytes + (4 << 20))
    vmem_limit = max(16 << 20, min(vmem_limit, 60 << 20))

    partials = pl.pallas_call(
        kernel,
        out_shape=jax.ShapeDtypeStruct((num_parts, acc_rows, LANES),
                                       jnp.float32),
        grid_spec=pltpu.PrefetchScalarGridSpec(
            num_scalar_prefetch=0,
            grid=(num_parts, steps_per_part),
            in_specs=[
                pl.BlockSpec((block_rows_eff, LANES), in_idx),
                pl.BlockSpec((block_rows_eff, LANES), in_idx),
            ],
            out_specs=pl.BlockSpec((1, acc_rows, LANES),
                                   lambda p, i: (p, 0, 0)),
        ),
        compiler_params=pltpu.CompilerParams(
            dimension_semantics=("parallel", "arbitrary"),
            vmem_limit_bytes=vmem_limit,
        ),
    )(k2d, y2d)

    # Final tiny reduce + mean + scale in the wrapper (one small XLA op).
    total = jnp.sum(partials, dtype=jnp.float32) + tail_sum
    return (total / jnp.float32(n_elems)) * jnp.float32(100000.0)


if __name__ == "__main__":
    key = jax.random.PRNGKey(0)
    k_key, y_key = jax.random.split(key)

    # Small IVIM-style NCHW tensors (128-aligned element count, single block).
    shape = (2, 4, 16, 16)
    k = jax.random.normal(k_key, shape, dtype=jnp.float32)
    y = jax.random.normal(y_key, shape, dtype=jnp.float32)
    ref = jnp.mean((k - y) ** 2) * 100000.0

    loss = jax.jit(kernel_loss)(k, y)
    jax.block_until_ready(loss)
    assert jnp.allclose(loss, ref, rtol=1e-5, atol=1e-3), (loss, ref)

    # Non-128-aligned element count: exercises the wrapper-tail path with a
    # single full-extent block (no pad, no mask).
    shape2 = (3, 5, 7, 11)
    k2 = jax.random.normal(k_key, shape2, dtype=jnp.float32)
    y2 = jax.random.normal(y_key, shape2, dtype=jnp.float32)
    ref2 = jnp.mean((k2 - y2) ** 2) * 100000.0
    loss2 = jax.jit(kernel_loss)(k2, y2)
    jax.block_until_ready(loss2)
    assert jnp.allclose(loss2, ref2, rtol=1e-5, atol=1e-3), (loss2, ref2)

    # Small block forces multiple blocks: even block count -> 2-way "parallel"
    # partition path with per-partition partial sums.
    loss3 = jax.jit(functools.partial(kernel_loss, block_rows=8))(k, y)
    jax.block_until_ready(loss3)
    assert jnp.allclose(loss3, ref, rtol=1e-5, atol=1e-3), (loss3, ref)

    # Odd block count -> 2-way split with a clamped/skipped overhang step.
    shape4 = (2, 4, 16, 24)   # 3072 elems = 24 rows; block_rows=8 -> 3 blocks
    k4 = jax.random.normal(k_key, shape4, dtype=jnp.float32)
    y4 = jax.random.normal(y_key, shape4, dtype=jnp.float32)
    ref4 = jnp.mean((k4 - y4) ** 2) * 100000.0
    loss4 = jax.jit(functools.partial(kernel_loss, block_rows=8))(k4, y4)
    jax.block_until_ready(loss4)
    assert jnp.allclose(loss4, ref4, rtol=1e-5, atol=1e-3), (loss4, ref4)

    # Non-aligned + multi-block: masked last block + wrapper tail together.
    loss5 = jax.jit(functools.partial(kernel_loss, block_rows=8))(k2, y2)
    jax.block_until_ready(loss5)
    assert jnp.allclose(loss5, ref2, rtol=1e-5, atol=1e-3), (loss5, ref2)

    print("KERNEL_OK")
</pallas_src>

<mosaic_0001>
module attributes {stable_mosaic.version = 11 : i64} {
  func.func @kernel(%arg0: i32, %arg1: i32, %arg2: memref<16x128xf32, #tpu.memory_space<vmem>>, %arg3: memref<16x128xf32, #tpu.memory_space<vmem>>, %arg4: memref<1x16x128xf32, #tpu.memory_space<vmem>>) attributes {dimension_semantics = [#tpu.dimension_semantics<parallel>, #tpu.dimension_semantics<arbitrary>], iteration_bounds = array<i64: 1, 1>, scalar_prefetch = 0 : i64, scratch_operands = 0 : i64, tpu.core_type = #tpu.core_type<tc>, window_params = [{transform_indices = @transform_0, window_bounds = array<i64: 16, 128>}, {transform_indices = @transform_1, window_bounds = array<i64: 16, 128>}, {transform_indices = @transform_2, window_bounds = array<i64: 1, 16, 128>}]} {
    %c0_i32 = arith.constant 0 : i32
    %0 = arith.cmpi eq, %arg1, %c0_i32 : i32
    %1 = arith.extui %0 : i1 to i32
    %c0_i32_0 = arith.constant 0 : i32
    %2 = arith.cmpi ne, %1, %c0_i32_0 : i32
    scf.if %2 {
      %cst_10 = arith.constant 0.000000e+00 : f32
      %13 = vector.broadcast %cst_10 : f32 to vector<1x16x128xf32>
      %c0_11 = arith.constant 0 : index
      %c0_12 = arith.constant 0 : index
      %c0_13 = arith.constant 0 : index
      %14 = vector.load %arg4[%c0_11, %c0_12, %c0_13] : memref<1x16x128xf32, #tpu.memory_space<vmem>>, vector<1x16x128xf32>
      tpu.vector_store %arg4[%c0_11, %c0_12, %c0_13], %13 {strides = array<i32>} : memref<1x16x128xf32, #tpu.memory_space<vmem>>, vector<1x16x128xf32>,
    } else {
    }
    %c0 = arith.constant 0 : index
    %c0_1 = arith.constant 0 : index
    %3 = vector.load %arg2[%c0, %c0_1] : memref<16x128xf32, #tpu.memory_space<vmem>>, vector<16x128xf32>
    %c0_2 = arith.constant 0 : index
    %c0_3 = arith.constant 0 : index
    %4 = vector.load %arg3[%c0_2, %c0_3] : memref<16x128xf32, #tpu.memory_space<vmem>>, vector<16x128xf32>
    %5 = arith.subf %3, %4 : vector<16x128xf32>
    %6 = arith.mulf %5, %5 : vector<16x128xf32>
    %7 = vector.shape_cast %6 : vector<16x128xf32> to vector<1x16x128xf32>
    %cst = arith.constant dense<0.000000e+00> : vector<16x128xf32>
    %8 = vector.multi_reduction <add>, %7, %cst [0] : vector<1x16x128xf32> to vector<16x128xf32>
    %c0_4 = arith.constant 0 : index
    %c0_5 = arith.constant 0 : index
    %c0_6 = arith.constant 0 : index
    %9 = vector.load %arg4[%c0_4, %c0_5, %c0_6] : memref<1x16x128xf32, #tpu.memory_space<vmem>>, vector<1x16x128xf32>
    %10 = vector.shape_cast %8 : vector<16x128xf32> to vector<1x16x128xf32>
    %11 = arith.addf %9, %10 : vector<1x16x128xf32>
    %c0_7 = arith.constant 0 : index
    %c0_8 = arith.constant 0 : index
    %c0_9 = arith.constant 0 : index
    %12 = vector.load %arg4[%c0_7, %c0_8, %c0_9] : memref<1x16x128xf32, #tpu.memory_space<vmem>>, vector<1x16x128xf32>
    tpu.vector_store %arg4[%c0_7, %c0_8, %c0_9], %11 {strides = array<i32>} : memref<1x16x128xf32, #tpu.memory_space<vmem>>, vector<1x16x128xf32>,
    return
  }
  func.func @transform_0(%arg0: i32, %arg1: i32) -> (i32, i32) {
    %c1_i32 = arith.constant 1 : i32
    %0 = arith.muli %arg0, %c1_i32 : i32
    %1 = arith.addi %0, %arg1 : i32
    %c0_i32 = arith.constant 0 : i32
    %c0_i32_0 = arith.constant 0 : i32
    return %1, %c0_i32 : i32, i32
  }
  func.func @transform_1(%arg0: i32, %arg1: i32) -> (i32, i32) {
    %c1_i32 = arith.constant 1 : i32
    %0 = arith.muli %arg0, %c1_i32 : i32
    %1 = arith.addi %0, %arg1 : i32
    %c0_i32 = arith.constant 0 : i32
    %c0_i32_0 = arith.constant 0 : i32
    return %1, %c0_i32 : i32, i32
  }
  func.func @transform_2(%arg0: i32, %arg1: i32) -> (i32, i32, i32) {
    %c0_i32 = arith.constant 0 : i32
    %c0_i32_0 = arith.constant 0 : i32
    %c0_i32_1 = arith.constant 0 : i32
    return %arg0, %c0_i32, %c0_i32_0 : i32, i32, i32
  }
}

</mosaic_0001>

<bundles_post_ra>
// kernel: kernel_loss.1
= control target key start
LH: loop header
LB: loop body
LE: loop exit
PB: predicated region body
PF: predicated region fallthrough
CT: control target
= control target key end

     0   :  { %s127_s0 = inlined_call_operand.vmem [shape: f32[16,128], index: 0, kind: input, shape index: {}]   ;;  %s128_s1 = inlined_call_operand.vmem [shape: f32[16,128], index: 1, kind: input, shape index: {}]   ;;  %s129_s2 = inlined_call_operand.vmem [shape: f32[1,16,128], index: 2, kind: output, shape index: {}]  }
   0x1   :  { %v61_v0 = vld [vmem:[%s127_s0] sm:$0xff]  ;;  %v62_v2 = vld [vmem:[%s127_s0 + $0x8] sm:$0xff] }
   0x2   :  { %v63_v1 = vld [vmem:[%s128_s1] sm:$0xff]  ;;  %v64_v4 = vld [vmem:[%s128_s1 + $0x8] sm:$0xff] }
   0x3   :  { %v65_v3 = vsub.f32 %v61_v0, %v63_v1  ;;  %v66_v5 = vsub.f32 %v62_v2, %v64_v4 }
   0x5   :  { %v67_v6 = vmul.f32 %v65_v3, %v65_v3  ;;  %v68_v7 = vmul.f32 %v66_v5, %v66_v5 }
   0x7   :  { %75 = vst [vmem:[%s129_s2] sm:$0xff] %v67_v6  ;;  %76 = vst [vmem:[%s129_s2 + $0x8] sm:$0xff] %v68_v7 }

</bundles_post_ra>
